<compile_context>
chip_gen: v5e
topology: v5e:2x2
jax: 0.10.0
libtpu: 0.0.40
codegen_flags: <defaults>
</compile_context>

<pallas_src>
import functools

import jax
import jax.numpy as jnp
from jax.experimental import pallas as pl
from jax.experimental.pallas import tpu as pltpu


def _round_up(x: int, m: int) -> int:
    return (x + m - 1) // m * m


def _vmem_capacity_bytes() -> int:
    """Per-core VMEM capacity; conservative 64 MiB (v7x) fallback."""
    try:
        return int(pltpu.get_tpu_info().vmem_capacity_bytes)
    except Exception:
        return 64 * 1024 * 1024


# --------------------------------------------------------------------------
# Kernel bodies
# --------------------------------------------------------------------------
def _ffn_resident_kernel(x_ref, w1_ref, b1_ref, w2_ref, b2_ref, o_ref, *, ff_chunks):
    """Weights fully resident in VMEM; loop over static d_ff chunks."""
    x = x_ref[...]
    acc = None
    for start, size in ff_chunks:
        h = jnp.dot(x, w1_ref[:, start:start + size],
                    preferred_element_type=jnp.float32)
        h = jnp.maximum(h + b1_ref[:, start:start + size], 0.0)
        # dropout -> identity (eval mode)
        c = jnp.dot(h.astype(w2_ref.dtype), w2_ref[start:start + size, :],
                    preferred_element_type=jnp.float32)
        acc = c if acc is None else acc + c
    o_ref[...] = (acc + b2_ref[...]).astype(o_ref.dtype)


def _ffn_stream_kernel(x_ref, w1_ref, b1_ref, b2_ref, w2_ref, o_ref, *scratch,
                       tile_ff):
    # NOTE: argument order below matches the in_specs order used in the
    # streaming branch of ffn_forward (b1 and b2 resident, W1/W2 streamed).
    del b2_ref  # only used in the finalize branch via closure-free reread
    raise NotImplementedError  # placeholder, real kernel defined next


# Real streaming kernel (kept the original argument order: x, W1, b1, W2, b2).
def _ffn_stream_kernel(x_ref, w1_ref, b1_ref, w2_ref, b2_ref, o_ref, *scratch,
                       tile_ff):
    """d_ff streamed as reduction grid axis j; W1/W2 tiles double-buffered."""
    acc_ref = scratch[0] if scratch else o_ref  # f32 output -> accumulate in place
    j = pl.program_id(1)
    start = pl.multiple_of(j * tile_ff, tile_ff)

    h = jnp.dot(x_ref[...], w1_ref[...], preferred_element_type=jnp.float32)
    h = jnp.maximum(h + b1_ref[:, pl.ds(start, tile_ff)], 0.0)
    # dropout -> identity (eval mode)
    contrib = jnp.dot(h.astype(w2_ref.dtype), w2_ref[...],
                      preferred_element_type=jnp.float32)

    @pl.when(j == 0)
    def _():
        acc_ref[...] = contrib            # first step: direct write, no zero+add

    @pl.when(j > 0)
    def _():
        acc_ref[...] += contrib

    @pl.when(j == pl.num_programs(1) - 1)
    def _():
        o_ref[...] = (acc_ref[...] + b2_ref[...]).astype(o_ref.dtype)


# --------------------------------------------------------------------------
# Wrapper
# --------------------------------------------------------------------------
def ffn_forward(x, w1, b1, w2, b2, *, tile_n=512, tile_ff=512,
                compute_dtype=jnp.bfloat16, allow_resident_weights=True):
    """x: (..., d_model) -> (..., d_model), matching PyTorch FFN.forward (eval)."""
    d_model = x.shape[-1]
    d_ff = w1.shape[-1]
    orig_shape = x.shape
    out_dtype = x.dtype

    x2d = x.reshape(-1, d_model).astype(compute_dtype)
    w1c = w1.astype(compute_dtype)
    w2c = w2.astype(compute_dtype)
    b1c = b1.reshape(1, d_ff).astype(jnp.float32)   # biases stay f32 (tiny)
    b2c = b2.reshape(1, d_model).astype(jnp.float32)

    n = x2d.shape[0]
    c_item = jnp.dtype(compute_dtype).itemsize
    o_item = jnp.dtype(out_dtype).itemsize
    use_scratch = jnp.dtype(out_dtype) != jnp.dtype(jnp.float32)

    # --- lane/sublane-friendly padding (minimal waste: 8 along N, 128 else) --
    # TODO(synk): round dm_pad to 256 on v6e/v7x (256x256 MXU) when d_model is
    # not already 256-aligned (gate on pltpu.get_tpu_info()).
    dm_pad = _round_up(d_model, 128)
    ff_pad128 = _round_up(d_ff, 128)
    n_pad8 = _round_up(n, 8)

    vmem_cap = _vmem_capacity_bytes()
    vmem_budget = int(0.8 * vmem_cap)

    tile_n = max(8, min(_round_up(tile_n, 8), n_pad8))
    # Expose >= 2 N-tiles when there is enough work (v7x has 2 TensorCores).
    if n_pad8 >= 512:
        tile_n = min(tile_n, _round_up((n_pad8 + 1) // 2, 8))
    tile_ff = max(128, min(_round_up(tile_ff, 128), ff_pad128))

    weight_bytes = 2 * dm_pad * ff_pad128 * c_item          # W1 + W2
    bias_bytes = 4 * (ff_pad128 + dm_pad)

    def resident_vmem(tn):
        # Assume Pallas keeps 2 buffers per input even for constant block index.
        return (2 * weight_bytes + 2 * bias_bytes
                + 2 * tn * dm_pad * (c_item + o_item)        # x / out tiles
                + tn * tile_ff * 4 + tn * dm_pad * 4)        # h chunk + live acc

    use_resident = allow_resident_weights and resident_vmem(8) <= vmem_budget

    if use_resident:
        while resident_vmem(tile_n) > vmem_budget and tile_n > 8:
            tile_n = max(8, _round_up(tile_n // 2, 8))
        ff_pad = ff_pad128
        n_pad = _round_up(n_pad8, tile_n)
        grid = (n_pad // tile_n,)

        ff_chunks, s = [], 0
        while s < ff_pad:
            size = min(tile_ff, ff_pad - s)
            ff_chunks.append((s, size))
            s += size

        kernel = functools.partial(_ffn_resident_kernel, ff_chunks=tuple(ff_chunks))
        in_specs = [
            pl.BlockSpec((tile_n, dm_pad), lambda i: (i, 0)),    # x
            pl.BlockSpec((dm_pad, ff_pad), lambda i: (0, 0)),    # W1 (resident)
            pl.BlockSpec((1, ff_pad), lambda i: (0, 0)),         # b1 (resident)
            pl.BlockSpec((ff_pad, dm_pad), lambda i: (0, 0)),    # W2 (resident)
            pl.BlockSpec((1, dm_pad), lambda i: (0, 0)),         # b2 (resident)
        ]
        out_specs = pl.BlockSpec((tile_n, dm_pad), lambda i: (i, 0))
        scratch_shapes = []
        dim_sem = ("parallel",)
        vmem_est = resident_vmem(tile_n)
        w_stream = 1                                             # weights DMA'd once
    else:
        def stream_vmem(tn, tff):
            return (2 * tn * dm_pad * (c_item + o_item)          # x / out tiles
                    + 2 * 2 * dm_pad * tff * c_item              # W1 + W2 tiles, x2 buf
                    + 2 * bias_bytes                             # b1 + b2 resident
                    + tn * tff * 4                               # h intermediate
                    + (tn * dm_pad * 4 if use_scratch else 0))   # f32 acc scratch

        while stream_vmem(tile_n, tile_ff) > vmem_budget and (tile_ff > 128 or tile_n > 8):
            if tile_ff > 128:
                tile_ff = max(128, _round_up(tile_ff // 2, 128))
            else:
                tile_n = max(8, _round_up(tile_n // 2, 8))

        ff_pad = _round_up(ff_pad128, tile_ff)
        n_pad = _round_up(n_pad8, tile_n)
        grid = (n_pad // tile_n, ff_pad // tile_ff)

        kernel = functools.partial(_ffn_stream_kernel, tile_ff=tile_ff)
        in_specs = [
            pl.BlockSpec((tile_n, dm_pad), lambda i, j: (i, 0)),   # x
            pl.BlockSpec((dm_pad, tile_ff), lambda i, j: (0, j)),  # W1 tile
            pl.BlockSpec((1, ff_pad), lambda i, j: (0, 0)),        # b1 (resident)
            pl.BlockSpec((tile_ff, dm_pad), lambda i, j: (j, 0)),  # W2 tile
            pl.BlockSpec((1, dm_pad), lambda i, j: (0, 0)),        # b2 (resident)
        ]
        out_specs = pl.BlockSpec((tile_n, dm_pad), lambda i, j: (i, 0))
        scratch_shapes = ([pltpu.VMEM((tile_n, dm_pad), jnp.float32)]
                          if use_scratch else [])
        dim_sem = ("parallel", "arbitrary")
        vmem_est = stream_vmem(tile_n, tile_ff)
        w_stream = n_pad // tile_n                                 # weights re-streamed per i

    # --- pad operands (zero padding is mathematically exact, sliced off) ----
    x_p = jnp.pad(x2d, ((0, n_pad - n), (0, dm_pad - d_model)))
    w1_p = jnp.pad(w1c, ((0, dm_pad - d_model), (0, ff_pad - d_ff)))
    b1_p = jnp.pad(b1c, ((0, 0), (0, ff_pad - d_ff)))
    w2_p = jnp.pad(w2c, ((0, ff_pad - d_ff), (0, dm_pad - d_model)))
    b2_p = jnp.pad(b2c, ((0, 0), (0, dm_pad - d_model)))

    # --- advisory cost estimate consistent with actual HBM traffic ----------
    flops = 4 * n_pad * dm_pad * ff_pad
    bytes_accessed = int(c_item * x_p.size
                         + w_stream * c_item * (w1_p.size + w2_p.size)
                         + 4 * (b1_p.size + b2_p.size)
                         + o_item * n_pad * dm_pad)
    cost = pl.CostEstimate(flops=flops, transcendentals=0,
                           bytes_accessed=bytes_accessed)

    vmem_limit = int(min(max(int(1.3 * vmem_est), 32 * 1024 * 1024),
                         int(0.9 * vmem_cap)))

    out = pl.pallas_call(
        kernel,
        out_shape=jax.ShapeDtypeStruct((n_pad, dm_pad), out_dtype),
        grid_spec=pltpu.PrefetchScalarGridSpec(
            num_scalar_prefetch=0,
            grid=grid,
            in_specs=in_specs,
            out_specs=out_specs,
            scratch_shapes=scratch_shapes,
        ),
        compiler_params=pltpu.CompilerParams(
            dimension_semantics=dim_sem,
            vmem_limit_bytes=vmem_limit,
        ),
        cost_estimate=cost,
    )(x_p, w1_p, b1_p, w2_p, b2_p)

    return out[:n, :d_model].reshape(orig_shape)


# --------------------------------------------------------------------------
# Reference + init helpers
# --------------------------------------------------------------------------
def init_ffn_params(key, d_model, d_ff, dtype=jnp.float32):
    """Deterministic init mirroring nn.Linear's uniform(-1/sqrt(fan_in), 1/sqrt(fan_in))."""
    k1, k2, k3, k4 = jax.random.split(key, 4)
    bound1 = 1.0 / (d_model ** 0.5)
    bound2 = 1.0 / (d_ff ** 0.5)
    # Stored transposed relative to PyTorch: (in_features, out_features).
    w1 = jax.random.uniform(k1, (d_model, d_ff), dtype, minval=-bound1, maxval=bound1)
    b1 = jax.random.uniform(k2, (d_ff,), dtype, minval=-bound1, maxval=bound1)
    w2 = jax.random.uniform(k3, (d_ff, d_model), dtype, minval=-bound2, maxval=bound2)
    b2 = jax.random.uniform(k4, (d_model,), dtype, minval=-bound2, maxval=bound2)
    return w1, b1, w2, b2


def _ref_ffn(x, w1, b1, w2, b2, compute_dtype=jnp.float32):
    """Reference mirroring the kernel's casting (bf16 operands, f32 accumulate)."""
    xc = x.astype(compute_dtype)
    w1c = w1.astype(compute_dtype)
    w2c = w2.astype(compute_dtype)
    h = jnp.maximum(
        jnp.dot(xc, w1c, preferred_element_type=jnp.float32)
        + b1.astype(jnp.float32), 0.0)
    o = (jnp.dot(h.astype(compute_dtype), w2c, preferred_element_type=jnp.float32)
         + b2.astype(jnp.float32))
    return o.astype(x.dtype)


if __name__ == "__main__":
    key = jax.random.PRNGKey(0)

    # --- test 1: small shape, f32 compute, resident-weight path --------------
    kx, kp = jax.random.split(key)
    batch, seq, d_model = 2, 8, 32
    d_ff = 4 * d_model
    x = jax.random.normal(kx, (batch, seq, d_model), dtype=jnp.float32)
    w1, b1, w2, b2 = init_ffn_params(kp, d_model, d_ff)
    out = jax.block_until_ready(
        ffn_forward(x, w1, b1, w2, b2, compute_dtype=jnp.float32))
    ref = _ref_ffn(x, w1, b1, w2, b2, jnp.float32)
    assert out.shape == x.shape
    assert jnp.allclose(out, ref, atol=1e-4, rtol=1e-4), "mismatch (test 1)"

    # --- test 2: streaming path forced, bf16 compute, multi-tile (i, j) grid,
    #             f32 output -> in-place o_ref accumulation (no scratch) ------
    kx2, kp2 = jax.random.split(jax.random.PRNGKey(1))
    x2 = jax.random.normal(kx2, (2, 40, 160), dtype=jnp.float32)
    w1b, b1b, w2b, b2b = init_ffn_params(kp2, 160, 384)
    out2 = jax.block_until_ready(
        ffn_forward(x2, w1b, b1b, w2b, b2b, tile_n=16, tile_ff=128,
                    allow_resident_weights=False))
    ref2 = _ref_ffn(x2, w1b, b1b, w2b, b2b, jnp.bfloat16)
    assert out2.shape == x2.shape
    assert jnp.allclose(out2, ref2, atol=1e-2, rtol=1e-2), "mismatch (test 2)"

    # --- test 3: resident-weight path, bf16 compute, multiple N tiles and
    #             multiple in-kernel d_ff chunks ------------------------------
    kx3, kp3 = jax.random.split(jax.random.PRNGKey(2))
    x3 = jax.random.normal(kx3, (4, 64, 128), dtype=jnp.float32)
    w1c_, b1c_, w2c_, b2c_ = init_ffn_params(kp3, 128, 512)
    out3 = jax.block_until_ready(
        ffn_forward(x3, w1c_, b1c_, w2c_, b2c_, tile_n=64, tile_ff=256))
    ref3 = _ref_ffn(x3, w1c_, b1c_, w2c_, b2c_, jnp.bfloat16)
    assert out3.shape == x3.shape
    assert jnp.allclose(out3, ref3, atol=1e-2, rtol=1e-2), "mismatch (test 3)"

    # --- test 4: streaming path with bf16 output -> f32 acc scratch used -----
    kx4, kp4 = jax.random.split(jax.random.PRNGKey(3))
    x4 = jax.random.normal(kx4, (2, 24, 64), dtype=jnp.bfloat16)
    w1d, b1d, w2d, b2d = init_ffn_params(kp4, 64, 256)
    out4 = jax.block_until_ready(
        ffn_forward(x4, w1d, b1d, w2d, b2d, tile_n=16, tile_ff=128,
                    allow_resident_weights=False))
    ref4 = _ref_ffn(x4, w1d, b1d, w2d, b2d, jnp.bfloat16)
    assert out4.shape == x4.shape
    assert jnp.allclose(out4.astype(jnp.float32), ref4.astype(jnp.float32),
                        atol=2e-2, rtol=2e-2), "mismatch (test 4)"

    print("KERNEL_OK")
</pallas_src>

<mosaic_0001>
module attributes {stable_mosaic.version = 11 : i64} {
  func.func @_ffn_resident_kernel(%arg0: i32, %arg1: memref<16x128xf32, #tpu.memory_space<vmem>>, %arg2: memref<128x128xf32, #tpu.memory_space<vmem>>, %arg3: memref<1x128xf32, #tpu.memory_space<vmem>>, %arg4: memref<128x128xf32, #tpu.memory_space<vmem>>, %arg5: memref<1x128xf32, #tpu.memory_space<vmem>>, %arg6: memref<16x128xf32, #tpu.memory_space<vmem>>) attributes {dimension_semantics = [#tpu.dimension_semantics<parallel>], iteration_bounds = array<i64: 1>, scalar_prefetch = 0 : i64, scratch_operands = 0 : i64, tpu.core_type = #tpu.core_type<tc>, window_params = [{transform_indices = @transform_0, window_bounds = array<i64: 16, 128>}, {pipeline_mode = #tpu.pipeline_mode<synchronous>, transform_indices = @transform_1, window_bounds = array<i64: 128, 128>}, {pipeline_mode = #tpu.pipeline_mode<synchronous>, transform_indices = @transform_2, window_bounds = array<i64: 1, 128>}, {pipeline_mode = #tpu.pipeline_mode<synchronous>, transform_indices = @transform_3, window_bounds = array<i64: 128, 128>}, {pipeline_mode = #tpu.pipeline_mode<synchronous>, transform_indices = @transform_4, window_bounds = array<i64: 1, 128>}, {transform_indices = @transform_5, window_bounds = array<i64: 16, 128>}]} {
    %c0 = arith.constant 0 : index
    %c0_0 = arith.constant 0 : index
    %0 = vector.load %arg1[%c0, %c0_0] : memref<16x128xf32, #tpu.memory_space<vmem>>, vector<16x128xf32>
    %c0_1 = arith.constant 0 : index
    %c0_2 = arith.constant 0 : index
    %1 = vector.load %arg2[%c0_1, %c0_2] : memref<128x128xf32, #tpu.memory_space<vmem>>, vector<128x128xf32>
    %cst = arith.constant dense<0.000000e+00> : vector<16x128xf32>
    %2 = tpu.matmul %0, %1, %cst {dimension_numbers = #tpu.dot_dimension_numbers<[1], [0], [0], [1], [0, 0, 1, 1], [], []>} : vector<16x128xf32>, vector<128x128xf32>, vector<16x128xf32> -> vector<16x128xf32>
    %c0_3 = arith.constant 0 : index
    %c0_4 = arith.constant 0 : index
    %3 = vector.load %arg3[%c0_3, %c0_4] : memref<1x128xf32, #tpu.memory_space<vmem>>, vector<1x128xf32>
    %4 = vector.broadcast %3 : vector<1x128xf32> to vector<16x128xf32>
    %5 = arith.addf %2, %4 : vector<16x128xf32>
    %cst_5 = arith.constant 0.000000e+00 : f32
    %6 = vector.broadcast %cst_5 : f32 to vector<16x128xf32>
    %7 = arith.maximumf %5, %6 : vector<16x128xf32>
    %c0_6 = arith.constant 0 : index
    %c0_7 = arith.constant 0 : index
    %8 = vector.load %arg4[%c0_6, %c0_7] : memref<128x128xf32, #tpu.memory_space<vmem>>, vector<128x128xf32>
    %cst_8 = arith.constant dense<0.000000e+00> : vector<16x128xf32>
    %9 = tpu.matmul %7, %8, %cst_8 {dimension_numbers = #tpu.dot_dimension_numbers<[1], [0], [0], [1], [0, 0, 1, 1], [], []>} : vector<16x128xf32>, vector<128x128xf32>, vector<16x128xf32> -> vector<16x128xf32>
    %c0_9 = arith.constant 0 : index
    %c0_10 = arith.constant 0 : index
    %10 = vector.load %arg5[%c0_9, %c0_10] : memref<1x128xf32, #tpu.memory_space<vmem>>, vector<1x128xf32>
    %11 = vector.broadcast %10 : vector<1x128xf32> to vector<16x128xf32>
    %12 = arith.addf %9, %11 : vector<16x128xf32>
    %c0_11 = arith.constant 0 : index
    %c0_12 = arith.constant 0 : index
    %13 = vector.load %arg6[%c0_11, %c0_12] : memref<16x128xf32, #tpu.memory_space<vmem>>, vector<16x128xf32>
    tpu.vector_store %arg6[%c0_11, %c0_12], %12 {strides = array<i32>} : memref<16x128xf32, #tpu.memory_space<vmem>>, vector<16x128xf32>,
    return
  }
  func.func @transform_0(%arg0: i32) -> (i32, i32) {
    %c0_i32 = arith.constant 0 : i32
    %c0_i32_0 = arith.constant 0 : i32
    return %arg0, %c0_i32 : i32, i32
  }
  func.func @transform_1(%arg0: i32) -> (i32, i32) {
    %c0_i32 = arith.constant 0 : i32
    %c0_i32_0 = arith.constant 0 : i32
    %c0_i32_1 = arith.constant 0 : i32
    return %c0_i32, %c0_i32_0 : i32, i32
  }
  func.func @transform_2(%arg0: i32) -> (i32, i32) {
    %c0_i32 = arith.constant 0 : i32
    %c0_i32_0 = arith.constant 0 : i32
    %c0_i32_1 = arith.constant 0 : i32
    return %c0_i32, %c0_i32_0 : i32, i32
  }
  func.func @transform_3(%arg0: i32) -> (i32, i32) {
    %c0_i32 = arith.constant 0 : i32
    %c0_i32_0 = arith.constant 0 : i32
    %c0_i32_1 = arith.constant 0 : i32
    return %c0_i32, %c0_i32_0 : i32, i32
  }
  func.func @transform_4(%arg0: i32) -> (i32, i32) {
    %c0_i32 = arith.constant 0 : i32
    %c0_i32_0 = arith.constant 0 : i32
    %c0_i32_1 = arith.constant 0 : i32
    return %c0_i32, %c0_i32_0 : i32, i32
  }
  func.func @transform_5(%arg0: i32) -> (i32, i32) {
    %c0_i32 = arith.constant 0 : i32
    %c0_i32_0 = arith.constant 0 : i32
    return %arg0, %c0_i32 : i32, i32
  }
}

</mosaic_0001>

<bundles_post_ra>
// kernel: tpu_custom_call.1
= control target key start
LH: loop header
LB: loop body
LE: loop exit
PB: predicated region body
PF: predicated region fallthrough
CT: control target
= control target key end

     0   :  { %10 = vsyncpa [#allocation3], 0  ;;  %s388_s0 = inlined_call_operand.hbm [shape: f32[16,128], index: 0, kind: input, shape index: {}]   ;;  %s389_s1 = inlined_call_operand.hbm [shape: f32[128,128], index: 1, kind: input, shape index: {}]   ;;  %s390_s2 = inlined_call_operand.vmem [shape: f32[1,128], index: 2, kind: input, shape index: {}]   ;;  %s391_s3 = inlined_call_operand.hbm [shape: f32[128,128], index: 3, kind: input, shape index: {}]   ;;  %s392_s4 = inlined_call_operand.vmem [shape: f32[1,128], index: 4, kind: input, shape index: {}]   ;;  %s393_s5 = inlined_call_operand.hbm [shape: f32[16,128], index: 5, kind: output, shape index: {}]  }
   0x1   :  { %11 = vsyncpa [#allocation6], 0 }
   0x2   :  { %12 = vsyncpa [#allocation4], 0  ;;  %s30_s20 = sshll.u32 %s389_s1, 4  ;;  %s322_s21 = smov [#allocation5]   ;;  %s31_s20 = int_to_ptr.hbm [resolvable:$true] %s30_s20 }
   0x3   :  { %s32_s22 = sshll.u32 %s322_s21, 4  ;;  %s17_s25 = sshll.u32 %s388_s0, 4  ;;  %s33_s22 = int_to_ptr.vmem [resolvable:$true] %s32_s22  ;;  %s18_s25 = int_to_ptr.hbm [resolvable:$true] %s17_s25 }
   0x4   :  { %s323_s26 = smov 128   ;;  %s324_s27 = smov 8  }
   0x5   :  { %38 = dma.hbm_to_vmem [thread:$0]  %s31_s20, 2048, %s33_s22, [#allocation6], %s323_s26, %s323_s26, %s324_s27  }
   0x6   :  { %s325_s28 = smov [#allocation2]   ;;  %s45_s1 = sshll.u32 %s391_s3, 4  ;;  %s46_s1 = int_to_ptr.hbm [resolvable:$true] %s45_s1 }
   0x7   :  { %s19_s29 = sshll.u32 %s325_s28, 4  ;;  %s326_s0 = smov [#allocation7]   ;;  %s20_s29 = int_to_ptr.vmem [resolvable:$true] %s19_s29 }
   0x8   :  { %25 = dma.hbm_to_vmem [thread:$0]  %s18_s25, 256, %s20_s29, [#allocation3], %s323_s26, %s323_s26, %s324_s27  }
   0x9   :  { %s47_s7 = sshll.u32 %s326_s0, 4  ;;  %s48_s7 = int_to_ptr.vmem [resolvable:$true] %s47_s7 }
   0xa   :  { %53 = dma.hbm_to_vmem [thread:$0]  %s46_s1, 2048, %s48_s7, [#allocation6], %s323_s26, %s323_s26, %s324_s27  }
   0xb   :  { %316 = dma.done.wait [#allocation3], 256  }
   0xc   :  { %317 = vsyncadd [#allocation3], 4294967040 }
   0xd   :  { %318 = dma.done.wait [#allocation6], 4096  }
   0xe   :  { %319 = vsyncadd [#allocation6], 4294963200  ;;  %v85_v0 = vld [vmem:[#allocation5 + $0x78] sm:$0xff]  ;;  %v84_v1 = vld [vmem:[#allocation5 + $0x70] sm:$0xff]  ;;  %s327_s11 = smov [#allocation8]  }
   0xf   :  { %180 = vmatpush.msra.mxu2 %v85_v0  ;;  %90 = vmatpush.msra.mxu0 %v85_v0  ;;  %v83_v2 = vld [vmem:[#allocation5 + $0x68] sm:$0xff]  ;;  %v82_v3 = vld [vmem:[#allocation5 + $0x60] sm:$0xff]  ;;  %v81_v4 = vld [vmem:[#allocation5 + $0x58] sm:$0xff]  ;;  %s164_s12 = sshll.u32 %s327_s11, 4  ;;  %s165_s12 = int_to_ptr.vmem [resolvable:$true] %s164_s12 }
  0x10   :  { %v130_v5 = vld [vmem:[#allocation7 + $0x78] sm:$0xff]  ;;  %v129_v6 = vld [vmem:[#allocation7 + $0x70] sm:$0xff]  ;;  %v128_v8 = vld [vmem:[#allocation7 + $0x68] sm:$0xff] }
  0x11   :  { %181 = vmatpush.msra.mxu2 %v84_v1  ;;  %91 = vmatpush.msra.mxu0 %v84_v1  ;;  %v80_v7 = vld [vmem:[#allocation5 + $0x50] sm:$0xff]  ;;  %v79_v9 = vld [vmem:[#allocation5 + $0x48] sm:$0xff]  ;;  %v127_v10 = vld [vmem:[#allocation7 + $0x60] sm:$0xff] }
  0x12   :  { %196 = vmatpush.msra.mxu3 %v130_v5  ;;  %135 = vmatpush.msra.mxu1 %v130_v5  ;;  %v78_v11 = vld [vmem:[#allocation5 + $0x40] sm:$0xff]  ;;  %v126_v12 = vld [vmem:[#allocation7 + $0x58] sm:$0xff]  ;;  %v125_v14 = vld [vmem:[#allocation7 + $0x50] sm:$0xff] }
  0x13   :  { %182 = vmatpush.msra.mxu2 %v83_v2  ;;  %92 = vmatpush.msra.mxu0 %v83_v2  ;;  %v77_v13 = vld [vmem:[#allocation5 + $0x38] sm:$0xff]  ;;  %v76_v15 = vld [vmem:[#allocation5 + $0x30] sm:$0xff]  ;;  %v124_v16 = vld [vmem:[#allocation7 + $0x48] sm:$0xff] }
  0x14   :  { %197 = vmatpush.msra.mxu3 %v129_v6  ;;  %136 = vmatpush.msra.mxu1 %v129_v6  ;;  %v75_v17 = vld [vmem:[#allocation5 + $0x28] sm:$0xff]  ;;  %v123_v18 = vld [vmem:[#allocation7 + $0x40] sm:$0xff]  ;;  %v122_v20 = vld [vmem:[#allocation7 + $0x38] sm:$0xff] }
  0x15   :  { %183 = vmatpush.msra.mxu2 %v82_v3  ;;  %93 = vmatpush.msra.mxu0 %v82_v3  ;;  %v74_v19 = vld [vmem:[#allocation5 + $0x20] sm:$0xff]  ;;  %v73_v21 = vld [vmem:[#allocation5 + $0x18] sm:$0xff]  ;;  %v121_v22 = vld [vmem:[#allocation7 + $0x30] sm:$0xff] }
  0x16   :  { %198 = vmatpush.msra.mxu3 %v128_v8  ;;  %137 = vmatpush.msra.mxu1 %v128_v8  ;;  %v72_v23 = vld [vmem:[#allocation5 + $0x10] sm:$0xff]  ;;  %v120_v24 = vld [vmem:[#allocation7 + $0x28] sm:$0xff]  ;;  %v119_v26 = vld [vmem:[#allocation7 + $0x20] sm:$0xff] }
  0x17   :  { %184 = vmatpush.msra.mxu2 %v81_v4  ;;  %94 = vmatpush.msra.mxu0 %v81_v4  ;;  %v71_v25 = vld [vmem:[#allocation5 + $0x8] sm:$0xff]  ;;  %v70_v27 = vld [vmem:[#allocation5] sm:$0xff]  ;;  %v69_v28 = vld [vmem:[#allocation2 + $0x8] sm:$0xff] }
  0x18   :  { %199 = vmatpush.msra.mxu3 %v127_v10  ;;  %138 = vmatpush.msra.mxu1 %v127_v10  ;;  %v68_v29 = vld [vmem:[#allocation2] sm:$0xff]  ;;  %v118_v30 = vld [vmem:[#allocation7 + $0x18] sm:$0xff]  ;;  %v116_v32 = vld [vmem:[#allocation7 + $0x8] sm:$0xff] }
  0x19   :  { %185 = vmatpush.msra.mxu2 %v80_v7  ;;  %95 = vmatpush.msra.mxu0 %v80_v7  ;;  %v117_v31 = vld [vmem:[#allocation7 + $0x10] sm:$0xff]  ;;  %v115_v33 = vld [vmem:[#allocation7] sm:$0xff] }
  0x1a   :  { %200 = vmatpush.msra.mxu3 %v126_v12  ;;  %139 = vmatpush.msra.mxu1 %v126_v12  ;;  %v218_v34 = vld [vmem:[%s390_s2] ss:$0 sm:$0xff]  ;;  %s166_s2 = sshll.u32 %s393_s5, 4  ;;  %s167_s2 = int_to_ptr.hbm [resolvable:$true] %s166_s2 }
  0x1b   :  { %186 = vmatpush.msra.mxu2 %v79_v9  ;;  %96 = vmatpush.msra.mxu0 %v79_v9  ;;  %v219_v41 = vld [vmem:[%s392_s4] ss:$0 sm:$0xff] }
  0x1c   :  { %201 = vmatpush.msra.mxu3 %v125_v14  ;;  %140 = vmatpush.msra.mxu1 %v125_v14 }
  0x1d   :  { %187 = vmatpush.msra.mxu2 %v78_v11  ;;  %97 = vmatpush.msra.mxu0 %v78_v11 }
  0x1e   :  { %202 = vmatpush.msra.mxu3 %v124_v16  ;;  %141 = vmatpush.msra.mxu1 %v124_v16 }
  0x1f   :  { %188 = vmatpush.msra.mxu2 %v77_v13  ;;  %98 = vmatpush.msra.mxu0 %v77_v13 }
  0x20   :  { %203 = vmatpush.msra.mxu3 %v123_v18  ;;  %142 = vmatpush.msra.mxu1 %v123_v18 }
  0x21   :  { %189 = vmatpush.msra.mxu2 %v76_v15  ;;  %99 = vmatpush.msra.mxu0 %v76_v15 }
  0x22   :  { %204 = vmatpush.msra.mxu3 %v122_v20  ;;  %143 = vmatpush.msra.mxu1 %v122_v20 }
  0x23   :  { %190 = vmatpush.msra.mxu2 %v75_v17  ;;  %100 = vmatpush.msra.mxu0 %v75_v17 }
  0x24   :  { %205 = vmatpush.msra.mxu3 %v121_v22  ;;  %144 = vmatpush.msra.mxu1 %v121_v22 }
  0x25   :  { %191 = vmatpush.msra.mxu2 %v74_v19  ;;  %101 = vmatpush.msra.mxu0 %v74_v19 }
  0x26   :  { %206 = vmatpush.msra.mxu3 %v120_v24  ;;  %145 = vmatpush.msra.mxu1 %v120_v24 }
  0x27   :  { %192 = vmatpush.msra.mxu2 %v73_v21  ;;  %102 = vmatpush.msra.mxu0 %v73_v21 }
  0x28   :  { %207 = vmatpush.msra.mxu3 %v119_v26  ;;  %146 = vmatpush.msra.mxu1 %v119_v26 }
  0x29   :  { %193 = vmatpush.msra.mxu2 %v72_v23  ;;  %103 = vmatpush.msra.mxu0 %v72_v23 }
  0x2a   :  { %208 = vmatpush.msra.mxu3 %v118_v30  ;;  %147 = vmatpush.msra.mxu1 %v118_v30 }
  0x2b   :  { %194 = vmatpush.msra.mxu2 %v71_v25  ;;  %104 = vmatpush.msra.mxu0 %v71_v25 }
  0x2c   :  { %209 = vmatpush.msra.mxu3 %v117_v31  ;;  %148 = vmatpush.msra.mxu1 %v117_v31 }
  0x2d   :  { %195 = vmatpush.msra.mxu2 %v70_v27  ;;  %105 = vmatpush.msra.mxu0 %v70_v27 }
  0x2e   :  { %109 = vmatmul.f32.vlgmr.msra.gmra.mxu2 %v69_v28  ;;  %106 = vmatmul.f32.vlgmr.msra.gmra.mxu0 %v68_v29 }
  0x2f   :  { %210 = vmatpush.msra.mxu3 %v116_v32  ;;  %149 = vmatpush.msra.mxu1 %v116_v32 }
  0x31   :  { %211 = vmatpush.msra.mxu3 %v115_v33  ;;  %150 = vmatpush.msra.mxu1 %v115_v33 }
  0xab   :  { %v107_v35 = vpop.f32.mrf.mxu0 }
  0xac   :  { %v108_v36 = vadd.f32 %v218_v34, %v107_v35 }
  0xae   :  { %v113_v37 = vmax.f32 %v108_v36, 0.0 }
  0xb0   :  { %151 = vmatmul.f32.vlgmr.msra.gmra.mxu1 %v113_v37 }
  0xb1   :  { %v110_v38 = vpop.f32.mrf.mxu2 }
  0xb2   :  { %v111_v39 = vadd.f32 %v218_v34, %v110_v38 }
  0xb4   :  { %v114_v40 = vmax.f32 %v111_v39, 0.0 }
  0xb6   :  { %154 = vmatmul.f32.vlgmr.msra.gmra.mxu3 %v114_v40 }
 0x12d   :  { %v152_v42 = vpop.f32.mrf.mxu1 }
 0x12e   :  { %v153_v43 = vadd.f32 %v219_v41, %v152_v42 }
 0x130   :  { %158 = vst [vmem:[#allocation8] sm:$0xff] %v153_v43 }
 0x139   :  { %v155_v44 = vpop.f32.mrf.mxu3 }
 0x13a   :  { %v156_v45 = vadd.f32 %v219_v41, %v155_v44 }
 0x13c   :  { %159 = vst [vmem:[#allocation8 + $0x8] sm:$0xff] %v156_v45 }
 0x13d   :  { %172 = dma.vmem_to_hbm [thread:$0]  %s165_s12, 256, %s167_s2, [#allocation4], %s323_s26, %s323_s26, %s324_s27  }
 0x13e   :  { %320 = dma.done.wait [#allocation4], 256  }
 0x13f   :  { %321 = vsyncadd [#allocation4], 4294967040 }
 0x140   :  { %177 = vsyncpa [#allocation3], 1 }
 0x141   :  { %178 = vsyncpa [#allocation6], 1 }
 0x142   :  { %179 = vsyncpa [#allocation4], 1 }

</bundles_post_ra>
